<compile_context>
chip_gen: v7x
topology: tpu7x:2x2x1
jax: 0.10.0
libtpu: 0.0.40
codegen_flags: <defaults>
</compile_context>

<pallas_src>
import functools

import jax
import jax.numpy as jnp
from jax.experimental import pallas as pl
from jax.experimental.pallas import tpu as pltpu


def ndecoder_kernel(x_ref,
                    w1_ref, b1_ref,
                    w2_ref, b2_ref,
                    w3_ref, b3_ref,
                    w4_ref, b4_ref,
                    scale_ref):
    """Fused MLP, batch on lanes.

    x_ref: (1, bm) treatment tile (f32).
    w1 (128,1) f32, b1 (128,1) f32,
    w2 (64,128) bf16, b2 (64,1) f32,
    w3 (32,64) bf16,  b3 (32,1) f32,
    w4 (32,1) f32 (transposed torch weight), b4 (1,1) f32.
    scale_ref: (1, bm) = exp(logsigma) + 1e-8.
    """
    x = x_ref[...]                                                # (1, bm)

    # Layer 1: contraction dim is 1 -> broadcast multiply on the VPU.
    h1 = jnp.maximum(w1_ref[...] * x + b1_ref[...], 0.0)          # (128, bm) f32

    # Layers 2-3: real contractions (K=128, K=64) on the MXU with bf16
    # operands and f32 accumulation; batch stays on the lane axis.
    h2 = jnp.dot(w2_ref[...], h1.astype(jnp.bfloat16),
                 preferred_element_type=jnp.float32)              # (64, bm) f32
    h2 = jnp.maximum(h2 + b2_ref[...], 0.0)

    h3 = jnp.dot(w3_ref[...], h2.astype(jnp.bfloat16),
                 preferred_element_type=jnp.float32)              # (32, bm) f32
    h3 = jnp.maximum(h3 + b3_ref[...], 0.0)

    # Layer 4: output dim is 1 -> elementwise multiply + sublane reduce (XLU).
    logsigma = jnp.sum(w4_ref[...] * h3, axis=0, keepdims=True) + b4_ref[...]
    # (1, bm)

    scale_ref[...] = (jnp.exp(logsigma) + 1e-8).astype(scale_ref.dtype)


def _choose_tile(B, bm_cap):
    """Pick batch tile (multiple of 128 lanes).

    Guarantees >= 2 grid steps when B > 128 (v7x megacore), caps the tile at
    `bm_cap` lanes, and derives the tile from B so pad waste stays small.
    """
    tiles = pl.cdiv(B, 128)                     # lane-tiles needed
    cap_tiles = max(1, bm_cap // 128)
    if tiles <= 1:
        n_steps = 1
    else:
        n_steps = max(2, pl.cdiv(tiles, cap_tiles))
    bm_tiles = min(cap_tiles, max(1, pl.cdiv(tiles, n_steps)))
    bm = 128 * bm_tiles
    grid = pl.cdiv(tiles, bm_tiles)
    return bm, grid


@functools.partial(jax.jit, static_argnames=("bm_cap",))
def ndecoder_forward(treatment, params, *, bm_cap=8192):
    """Returns (mu, scale) of the Normal the PyTorch module constructs."""
    (w1, b1), (w2, b2), (w3, b3), (w4, b4) = params
    B = treatment.shape[0]
    assert treatment.shape == (B, 1)

    # Lane-dense layout: batch on the 128-wide lane axis.
    x = treatment.reshape(1, B).astype(jnp.float32)

    bm, grid = _choose_tile(B, bm_cap)
    Bp = grid * bm
    if Bp != B:
        x = jnp.pad(x, ((0, 0), (0, Bp - B)))

    # bf16 operands for the two MXU matmuls (f32 accumulation in-kernel).
    w2c = w2.astype(jnp.bfloat16)
    w3c = w3.astype(jnp.bfloat16)
    # Layer-4 weight as a (32, 1) column for the VPU-multiply + sublane reduce.
    w4c = w4.T.astype(jnp.float32)              # (1, 32) -> (32, 1)

    full = lambda a: pl.BlockSpec(a.shape, lambda i: (0, 0))  # grid-invariant

    grid_spec = pltpu.PrefetchScalarGridSpec(
        num_scalar_prefetch=0,
        grid=(grid,),
        in_specs=[
            pl.BlockSpec((1, bm), lambda i: (0, i)),   # treatment tile
            full(w1), full(b1),
            full(w2c), full(b2),
            full(w3c), full(b3),
            full(w4c), full(b4),
        ],
        out_specs=pl.BlockSpec((1, bm), lambda i: (0, i)),   # scale tile
    )

    scale = pl.pallas_call(
        ndecoder_kernel,
        grid_spec=grid_spec,
        out_shape=jax.ShapeDtypeStruct((1, Bp), jnp.float32),
        compiler_params=pltpu.CompilerParams(
            dimension_semantics=("parallel",)),
    )(x, w1, b1, w2c, b2, w3c, b3, w4c, b4)

    scale = scale[:, :B].reshape(B, 1)
    mu = treatment                      # identity -- no kernel store needed
    return mu, scale


def init_params(key):
    """Deterministic Linear params, PyTorch-style U(-1/sqrt(fan_in), 1/sqrt(fan_in)).

    Weights stored (out, in) (native torch.nn.Linear layout); biases (out, 1).
    """
    dims = [(1, 128), (128, 64), (64, 32), (32, 1)]
    params = []
    for (fan_in, fan_out) in dims:
        key, kw, kb = jax.random.split(key, 3)
        bound = 1.0 / (fan_in ** 0.5)
        w = jax.random.uniform(kw, (fan_out, fan_in), jnp.float32, -bound, bound)
        b = jax.random.uniform(kb, (fan_out, 1), jnp.float32, -bound, bound)
        params.append((w, b))
    return params


def ndecoder_reference(treatment, params):
    """Pure-JAX f32 reference of the PyTorch forward (eval mode)."""
    (w1, b1), (w2, b2), (w3, b3), (w4, b4) = params
    h = jnp.maximum(treatment @ w1.T + b1.T, 0.0)
    h = jnp.maximum(h @ w2.T + b2.T, 0.0)
    h = jnp.maximum(h @ w3.T + b3.T, 0.0)
    logsigma = h @ w4.T + b4.T
    return treatment, jnp.exp(logsigma) + 1e-8


if __name__ == "__main__":
    key = jax.random.PRNGKey(0)
    k_param, k_x = jax.random.split(key)

    params = init_params(k_param)
    B = 300   # deliberately not a multiple of 128 to exercise the pad path
    treatment = jax.random.normal(k_x, (B, 1), jnp.float32)

    # Default tile cap (2 grid steps here) ...
    mu, scale = ndecoder_forward(treatment, params)
    # ... and a 128-lane tile to exercise a longer parallel grid.
    mu2, scale2 = ndecoder_forward(treatment, params, bm_cap=128)
    jax.block_until_ready((mu, scale, mu2, scale2))

    mu_ref, scale_ref = ndecoder_reference(treatment, params)
    # mu is an exact identity.
    assert jnp.allclose(mu, mu_ref, atol=1e-6, rtol=1e-6)
    assert jnp.allclose(mu2, mu_ref, atol=1e-6, rtol=1e-6)
    # scale goes through bf16 MXU matmuls -> looser tolerance than pure f32.
    assert jnp.allclose(scale, scale_ref, atol=3e-2, rtol=3e-2)
    assert jnp.allclose(scale2, scale_ref, atol=3e-2, rtol=3e-2)

    print("KERNEL_OK")
</pallas_src>

<mosaic_0001>
module attributes {stable_mosaic.version = 11 : i64} {
  func.func @ndecoder_kernel(%arg0: i32, %arg1: memref<1x256xf32, #tpu.memory_space<vmem>>, %arg2: memref<128x1xf32, #tpu.memory_space<vmem>>, %arg3: memref<128x1xf32, #tpu.memory_space<vmem>>, %arg4: memref<64x128xbf16, #tpu.memory_space<vmem>>, %arg5: memref<64x1xf32, #tpu.memory_space<vmem>>, %arg6: memref<32x64xbf16, #tpu.memory_space<vmem>>, %arg7: memref<32x1xf32, #tpu.memory_space<vmem>>, %arg8: memref<32x1xf32, #tpu.memory_space<vmem>>, %arg9: memref<1x1xf32, #tpu.memory_space<vmem>>, %arg10: memref<1x256xf32, #tpu.memory_space<vmem>>) attributes {dimension_semantics = [#tpu.dimension_semantics<parallel>], iteration_bounds = array<i64: 2>, scalar_prefetch = 0 : i64, scratch_operands = 0 : i64, tpu.core_type = #tpu.core_type<tc>, window_params = [{transform_indices = @transform_0, window_bounds = array<i64: 1, 256>}, {pipeline_mode = #tpu.pipeline_mode<synchronous>, transform_indices = @transform_1, window_bounds = array<i64: 128, 1>}, {pipeline_mode = #tpu.pipeline_mode<synchronous>, transform_indices = @transform_2, window_bounds = array<i64: 128, 1>}, {pipeline_mode = #tpu.pipeline_mode<synchronous>, transform_indices = @transform_3, window_bounds = array<i64: 64, 128>}, {pipeline_mode = #tpu.pipeline_mode<synchronous>, transform_indices = @transform_4, window_bounds = array<i64: 64, 1>}, {pipeline_mode = #tpu.pipeline_mode<synchronous>, transform_indices = @transform_5, window_bounds = array<i64: 32, 64>}, {pipeline_mode = #tpu.pipeline_mode<synchronous>, transform_indices = @transform_6, window_bounds = array<i64: 32, 1>}, {pipeline_mode = #tpu.pipeline_mode<synchronous>, transform_indices = @transform_7, window_bounds = array<i64: 32, 1>}, {pipeline_mode = #tpu.pipeline_mode<synchronous>, transform_indices = @transform_8, window_bounds = array<i64: 1, 1>}, {transform_indices = @transform_9, window_bounds = array<i64: 1, 256>}]} {
    %c0 = arith.constant 0 : index
    %c0_0 = arith.constant 0 : index
    %0 = vector.load %arg1[%c0, %c0_0] : memref<1x256xf32, #tpu.memory_space<vmem>>, vector<1x256xf32>
    %c0_1 = arith.constant 0 : index
    %c0_2 = arith.constant 0 : index
    %1 = vector.load %arg2[%c0_1, %c0_2] : memref<128x1xf32, #tpu.memory_space<vmem>>, vector<128x1xf32>
    %2 = vector.broadcast %1 : vector<128x1xf32> to vector<128x256xf32>
    %3 = vector.broadcast %0 : vector<1x256xf32> to vector<128x256xf32>
    %4 = arith.mulf %2, %3 : vector<128x256xf32>
    %c0_3 = arith.constant 0 : index
    %c0_4 = arith.constant 0 : index
    %5 = vector.load %arg3[%c0_3, %c0_4] : memref<128x1xf32, #tpu.memory_space<vmem>>, vector<128x1xf32>
    %6 = vector.broadcast %5 : vector<128x1xf32> to vector<128x256xf32>
    %7 = arith.addf %4, %6 : vector<128x256xf32>
    %cst = arith.constant 0.000000e+00 : f32
    %8 = vector.broadcast %cst : f32 to vector<128x256xf32>
    %9 = arith.maximumf %7, %8 : vector<128x256xf32>
    %c0_5 = arith.constant 0 : index
    %c0_6 = arith.constant 0 : index
    %10 = vector.load %arg4[%c0_5, %c0_6] : memref<64x128xbf16, #tpu.memory_space<vmem>>, vector<64x128xbf16>
    %11 = arith.truncf %9 : vector<128x256xf32> to vector<128x256xbf16>
    %cst_7 = arith.constant dense<0.000000e+00> : vector<64x256xf32>
    %12 = tpu.matmul %10, %11, %cst_7 {dimension_numbers = #tpu.dot_dimension_numbers<[1], [0], [0], [1], [0, 0, 1, 1], [], []>} : vector<64x128xbf16>, vector<128x256xbf16>, vector<64x256xf32> -> vector<64x256xf32>
    %c0_8 = arith.constant 0 : index
    %c0_9 = arith.constant 0 : index
    %13 = vector.load %arg5[%c0_8, %c0_9] : memref<64x1xf32, #tpu.memory_space<vmem>>, vector<64x1xf32>
    %14 = vector.broadcast %13 : vector<64x1xf32> to vector<64x256xf32>
    %15 = arith.addf %12, %14 : vector<64x256xf32>
    %cst_10 = arith.constant 0.000000e+00 : f32
    %16 = vector.broadcast %cst_10 : f32 to vector<64x256xf32>
    %17 = arith.maximumf %15, %16 : vector<64x256xf32>
    %c0_11 = arith.constant 0 : index
    %c0_12 = arith.constant 0 : index
    %18 = vector.load %arg6[%c0_11, %c0_12] : memref<32x64xbf16, #tpu.memory_space<vmem>>, vector<32x64xbf16>
    %19 = arith.truncf %17 : vector<64x256xf32> to vector<64x256xbf16>
    %cst_13 = arith.constant dense<0.000000e+00> : vector<32x256xf32>
    %20 = tpu.matmul %18, %19, %cst_13 {dimension_numbers = #tpu.dot_dimension_numbers<[1], [0], [0], [1], [0, 0, 1, 1], [], []>} : vector<32x64xbf16>, vector<64x256xbf16>, vector<32x256xf32> -> vector<32x256xf32>
    %c0_14 = arith.constant 0 : index
    %c0_15 = arith.constant 0 : index
    %21 = vector.load %arg7[%c0_14, %c0_15] : memref<32x1xf32, #tpu.memory_space<vmem>>, vector<32x1xf32>
    %22 = vector.broadcast %21 : vector<32x1xf32> to vector<32x256xf32>
    %23 = arith.addf %20, %22 : vector<32x256xf32>
    %cst_16 = arith.constant 0.000000e+00 : f32
    %24 = vector.broadcast %cst_16 : f32 to vector<32x256xf32>
    %25 = arith.maximumf %23, %24 : vector<32x256xf32>
    %c0_17 = arith.constant 0 : index
    %c0_18 = arith.constant 0 : index
    %26 = vector.load %arg8[%c0_17, %c0_18] : memref<32x1xf32, #tpu.memory_space<vmem>>, vector<32x1xf32>
    %27 = vector.broadcast %26 : vector<32x1xf32> to vector<32x256xf32>
    %28 = arith.mulf %27, %25 : vector<32x256xf32>
    %cst_19 = arith.constant dense<0.000000e+00> : vector<256xf32>
    %29 = vector.multi_reduction <add>, %28, %cst_19 [0] : vector<32x256xf32> to vector<256xf32>
    %30 = vector.shape_cast %29 : vector<256xf32> to vector<1x256xf32>
    %c0_20 = arith.constant 0 : index
    %c0_21 = arith.constant 0 : index
    %31 = vector.load %arg9[%c0_20, %c0_21] : memref<1x1xf32, #tpu.memory_space<vmem>>, vector<1x1xf32>
    %32 = vector.broadcast %31 : vector<1x1xf32> to vector<1x256xf32>
    %33 = arith.addf %30, %32 : vector<1x256xf32>
    %34 = math.exp %33 : vector<1x256xf32>
    %cst_22 = arith.constant 9.99999993E-9 : f32
    %35 = vector.broadcast %cst_22 : f32 to vector<1x256xf32>
    %36 = arith.addf %34, %35 : vector<1x256xf32>
    %c0_23 = arith.constant 0 : index
    %c0_24 = arith.constant 0 : index
    %37 = vector.load %arg10[%c0_23, %c0_24] : memref<1x256xf32, #tpu.memory_space<vmem>>, vector<1x256xf32>
    tpu.vector_store %arg10[%c0_23, %c0_24], %36 {strides = array<i32>} : memref<1x256xf32, #tpu.memory_space<vmem>>, vector<1x256xf32>,
    return
  }
  func.func @transform_0(%arg0: i32) -> (i32, i32) {
    %c0_i32 = arith.constant 0 : i32
    %c0_i32_0 = arith.constant 0 : i32
    return %c0_i32, %arg0 : i32, i32
  }
  func.func @transform_1(%arg0: i32) -> (i32, i32) {
    %c0_i32 = arith.constant 0 : i32
    %c0_i32_0 = arith.constant 0 : i32
    %c0_i32_1 = arith.constant 0 : i32
    return %c0_i32, %c0_i32_0 : i32, i32
  }
  func.func @transform_2(%arg0: i32) -> (i32, i32) {
    %c0_i32 = arith.constant 0 : i32
    %c0_i32_0 = arith.constant 0 : i32
    %c0_i32_1 = arith.constant 0 : i32
    return %c0_i32, %c0_i32_0 : i32, i32
  }
  func.func @transform_3(%arg0: i32) -> (i32, i32) {
    %c0_i32 = arith.constant 0 : i32
    %c0_i32_0 = arith.constant 0 : i32
    %c0_i32_1 = arith.constant 0 : i32
    return %c0_i32, %c0_i32_0 : i32, i32
  }
  func.func @transform_4(%arg0: i32) -> (i32, i32) {
    %c0_i32 = arith.constant 0 : i32
    %c0_i32_0 = arith.constant 0 : i32
    %c0_i32_1 = arith.constant 0 : i32
    return %c0_i32, %c0_i32_0 : i32, i32
  }
  func.func @transform_5(%arg0: i32) -> (i32, i32) {
    %c0_i32 = arith.constant 0 : i32
    %c0_i32_0 = arith.constant 0 : i32
    %c0_i32_1 = arith.constant 0 : i32
    return %c0_i32, %c0_i32_0 : i32, i32
  }
  func.func @transform_6(%arg0: i32) -> (i32, i32) {
    %c0_i32 = arith.constant 0 : i32
    %c0_i32_0 = arith.constant 0 : i32
    %c0_i32_1 = arith.constant 0 : i32
    return %c0_i32, %c0_i32_0 : i32, i32
  }
  func.func @transform_7(%arg0: i32) -> (i32, i32) {
    %c0_i32 = arith.constant 0 : i32
    %c0_i32_0 = arith.constant 0 : i32
    %c0_i32_1 = arith.constant 0 : i32
    return %c0_i32, %c0_i32_0 : i32, i32
  }
  func.func @transform_8(%arg0: i32) -> (i32, i32) {
    %c0_i32 = arith.constant 0 : i32
    %c0_i32_0 = arith.constant 0 : i32
    %c0_i32_1 = arith.constant 0 : i32
    return %c0_i32, %c0_i32_0 : i32, i32
  }
  func.func @transform_9(%arg0: i32) -> (i32, i32) {
    %c0_i32 = arith.constant 0 : i32
    %c0_i32_0 = arith.constant 0 : i32
    return %c0_i32, %arg0 : i32, i32
  }
}

</mosaic_0001>

<bundles_post_ra>
// kernel: ndecoder_forward.1
= control target key start
LH: loop header
LB: loop body
LE: loop exit
PB: predicated region body
PF: predicated region fallthrough
CT: control target
= control target key end

     0   :  { %s1173_s11 = smov 0   ;;  %s1413_s0 = inlined_call_operand.vmem [shape: f32[1,512], index: 0, kind: input, shape index: {}]   ;;  %s1414_s1 = inlined_call_operand.vmem [shape: f32[128,1], index: 1, kind: input, shape index: {}]   ;;  %s1415_s2 = inlined_call_operand.vmem [shape: f32[128,1], index: 2, kind: input, shape index: {}]   ;;  %s1416_s3 = inlined_call_operand.vmem [shape: bf16[64,128], index: 3, kind: input, shape index: {}]   ;;  %s1417_s4 = inlined_call_operand.vmem [shape: f32[64,1], index: 4, kind: input, shape index: {}]   ;;  %s1418_s5 = inlined_call_operand.vmem [shape: bf16[32,64], index: 5, kind: input, shape index: {}]   ;;  %s1419_s6 = inlined_call_operand.vmem [shape: f32[32,1], index: 6, kind: input, shape index: {}]   ;;  %s1420_s7 = inlined_call_operand.vmem [shape: f32[32,1], index: 7, kind: input, shape index: {}]   ;;  %s1421_s8 = inlined_call_operand.<no memory space> [shape: f32[1,1], index: 8, kind: input, shape index: {}]   ;;  %s1422_s9 = inlined_call_operand.vmem [shape: f32[1,512], index: 9, kind: output, shape index: {}]  }
   0x1   :  { %v14_v0 = vstv %s1421_s8 }
   0x2   :  { %15 = vst [vmem:[#allocation2] sm:$0x1] %v14_v0 }
   0x3 LB: > { %s1071_s12 = sadd.s32 4294967295, %s1116_s11   ;;  %p1075_p0 = scmp.ge.s32.totalorder %s1116_s11, 1  ;;  %s1116_s11 = sphi %s1173_s11, %s21_s11  }
   0x4   : > { %p289_p1 = scmp.lt.s32.totalorder %s1116_s11, 3 }
   0x6   : > { %p290_p2 = pnand %p1075_p0, %p289_p1 }
   0x7   : > { %v474_v1 = vld [vmem:[%s1415_s2] sm:$0xff] (!%p290_p2)  ;;  %v1118_v3 = vmov (!%p290_p2), 0   ;;  %v475_v4 = vld [vmem:[%s1415_s2 + $0x8] sm:$0xff] (!%p290_p2)  ;;  %v338_v6 = vld [vmem:[%s1414_s1 + $0x18] sm:$0xff] (!%p290_p2)  ;;  %s1076_s28 = sshll.u32 (!%p290_p2), %s1071_s12, 1  ;;  %v432_v51 = vlaneseq (!%p290_p2)  ;;  %vm865_vm0 = vcmask (!%p290_p2), 523264  }
   0x8   : > { %293 = sbr.rel (%p290_p2) target bundleno = 723 (0x2d3), region = 56  ;;  %v335_v2 = vld [vmem:[%s1414_s1] sm:$0xff] (!%p290_p2)  ;;  %1099 = vset.pattern.permute.xlu1 (!%p290_p2), %v1118_v3  ;;  %1098 = vset.pattern.permute.xlu0 (!%p290_p2), %v1118_v3  ;;  %v336_v5 = vld [vmem:[%s1414_s1 + $0x8] sm:$0xff] (!%p290_p2)  ;;  %v337_v7 = vld [vmem:[%s1414_s1 + $0x10] sm:$0xff] (!%p290_p2)  ;;  %p324_p3 = scmp.lt.s32.totalorder (!%p290_p2), %s1076_s28, 3 }
   0x9   : > { %492 = vperm.xlu1 (!%p290_p2), %1099, %v474_v1   ;;  %353 = vperm.xlu0 (!%p290_p2), %1098, %v335_v2   ;;  %v477_v8 = vld [vmem:[%s1415_s2 + $0x18] sm:$0xff] (!%p290_p2)  ;;  %v476_v9 = vld [vmem:[%s1415_s2 + $0x10] sm:$0xff] (!%p290_p2)  ;;  %v340_v10 = vld [vmem:[%s1414_s1 + $0x28] sm:$0xff] (!%p290_p2)  ;;  %v1334_v52 = vshrl.u32 (!%p290_p2), %v432_v51, 7  ;;  %vm1021_vm1 = vcmp.lt.s32.totalorder (!%p290_p2), %v432_v51, 256 }
   0xa   : > { %762 = vmatprep.mubr.bf16.mxu0 (!%p290_p2), %v1118_v3  ;;  %904 = vmatprep.mubr.bf16.mxu1 (!%p290_p2), %v1118_v3  ;;  %v339_v11 = vld [vmem:[%s1414_s1 + $0x20] sm:$0xff] (!%p290_p2)  ;;  %v479_v12 = vld [vmem:[%s1415_s2 + $0x28] sm:$0xff] (!%p290_p2)  ;;  %v342_v14 = vld [vmem:[%s1414_s1 + $0x38] sm:$0xff] (!%p290_p2) }
   0xb   : > { %v478_v13 = vld [vmem:[%s1415_s2 + $0x20] sm:$0xff] (!%p290_p2)  ;;  %v341_v15 = vld [vmem:[%s1414_s1 + $0x30] sm:$0xff] (!%p290_p2)  ;;  %v481_v16 = vld [vmem:[%s1415_s2 + $0x38] sm:$0xff] (!%p290_p2)  ;;  %v434_v53 = vsub.s32 (!%p290_p2), 0, %v1334_v52  ;;  %v438_v54 = vsub.s32 (!%p290_p2), 1, %v1334_v52 }
   0xc   : > { %v480_v17 = vld [vmem:[%s1415_s2 + $0x30] sm:$0xff] (!%p290_p2)  ;;  %v344_v18 = vld [vmem:[%s1414_s1 + $0x48] sm:$0xff] (!%p290_p2)  ;;  %v343_v19 = vld [vmem:[%s1414_s1 + $0x40] sm:$0xff] (!%p290_p2) }
   0xd   : > { %497 = vperm.xlu1 (!%p290_p2), %1099, %v475_v4   ;;  %358 = vperm.xlu0 (!%p290_p2), %1098, %v336_v5   ;;  %v483_v20 = vld [vmem:[%s1415_s2 + $0x48] sm:$0xff] (!%p290_p2)  ;;  %v482_v21 = vld [vmem:[%s1415_s2 + $0x40] sm:$0xff] (!%p290_p2)  ;;  %v346_v22 = vld [vmem:[%s1414_s1 + $0x58] sm:$0xff] (!%p290_p2) }
   0xe   : > { %v345_v23 = vld [vmem:[%s1414_s1 + $0x50] sm:$0xff] (!%p290_p2)  ;;  %v485_v24 = vld [vmem:[%s1415_s2 + $0x58] sm:$0xff] (!%p290_p2)  ;;  %v348_v26 = vld [vmem:[%s1414_s1 + $0x68] sm:$0xff] (!%p290_p2) }
   0xf   : > { %v484_v25 = vld [vmem:[%s1415_s2 + $0x50] sm:$0xff]  ;;  %v347_v27 = vld [vmem:[%s1414_s1 + $0x60] sm:$0xff]  ;;  %v487_v28 = vld [vmem:[%s1415_s2 + $0x68] sm:$0xff]  ;;  %s1424_s28 = smov (!%p324_p3, %s1076_s28), 3 }
  0x10   : > { %v486_v29 = vld [vmem:[%s1415_s2 + $0x60] sm:$0xff]  ;;  %v350_v30 = vld [vmem:[%s1414_s1 + $0x78] sm:$0xff]  ;;  %v349_v31 = vld [vmem:[%s1414_s1 + $0x70] sm:$0xff]  ;;  %s326_s10 = scalar_lea.vmem %s1413_s0, %s1424_s28  ;;  %s331_s25 = scalar_lea.vmem %s1422_s9, %s1424_s28 }
  0x11   : > { %368 = vperm.xlu1 %1099, %v338_v6   ;;  %363 = vperm.xlu0 %1098, %v337_v7   ;;  %v489_v32 = vld [vmem:[%s1415_s2 + $0x78] sm:$0xff]  ;;  %v488_v33 = vld [vmem:[%s1415_s2 + $0x70] sm:$0xff]  ;;  %v659_v34 = vld [vmem:[%s1417_s4 + $0x8] sm:$0xff] }
  0x12   : > { %v658_v35 = vld [vmem:[%s1417_s4] sm:$0xff]  ;;  %v661_v36 = vld [vmem:[%s1417_s4 + $0x18] sm:$0xff]  ;;  %v660_v37 = vld [vmem:[%s1417_s4 + $0x10] sm:$0xff] }
  0x13   : > { %v663_v38 = vld [vmem:[%s1417_s4 + $0x28] sm:$0xff]  ;;  %v662_v39 = vld [vmem:[%s1417_s4 + $0x20] sm:$0xff]  ;;  %v665_v40 = vld [vmem:[%s1417_s4 + $0x38] sm:$0xff] }
  0x14   : > { %v664_v41 = vld [vmem:[%s1417_s4 + $0x30] sm:$0xff]  ;;  %v832_v42 = vld [vmem:[%s1419_s6 + $0x8] sm:$0xff]  ;;  %v831_v43 = vld [vmem:[%s1419_s6] sm:$0xff] }
  0x15   : > { %507 = vperm.xlu1 %1099, %v477_v8   ;;  %502 = vperm.xlu0 %1098, %v476_v9   ;;  %v834_v44 = vld [vmem:[%s1419_s6 + $0x18] sm:$0xff]  ;;  %v833_v45 = vld [vmem:[%s1419_s6 + $0x10] sm:$0xff]  ;;  %v934_v46 = vld [vmem:[%s1420_s7 + $0x8] sm:$0xff] }
  0x16   : > { %v933_v47 = vld [vmem:[%s1420_s7] sm:$0xff]  ;;  %v936_v48 = vld [vmem:[%s1420_s7 + $0x18] sm:$0xff]  ;;  %v935_v49 = vld [vmem:[%s1420_s7 + $0x10] sm:$0xff] }
  0x17   : > { %v983_v50 = vld [vmem:[#allocation2] sm:$0x1] }
  0x18   : > { %v334_v55 = vld [vmem:[%s326_s10] sm:$0x3] }
  0x19   : > { %378 = vperm.xlu1 %1099, %v340_v10   ;;  %373 = vperm.xlu0 %1098, %v339_v11   ;;  %v1344_v56 = vrot.slane %v334_v55, %v434_v53  ;;  %v1346_v57 = vrot.slane %v334_v55, %v438_v54 }
  0x1d   : > { %517 = vperm.xlu1 %1099, %v479_v12   ;;  %512 = vperm.xlu0 %1098, %v478_v13  }
  0x21   : > { %388 = vperm.xlu1 %1099, %v342_v14   ;;  %383 = vperm.xlu0 %1098, %v341_v15  }
  0x25   : > { %527 = vperm.xlu1 %1099, %v481_v16   ;;  %522 = vperm.xlu0 %1098, %v480_v17  }
  0x29   : > { %398 = vperm.xlu1 %1099, %v344_v18   ;;  %393 = vperm.xlu0 %1098, %v343_v19  }
  0x2d   : > { %537 = vperm.xlu1 %1099, %v483_v20   ;;  %532 = vperm.xlu0 %1098, %v482_v21  }
  0x31   : > { %408 = vperm.xlu1 %1099, %v346_v22   ;;  %403 = vperm.xlu0 %1098, %v345_v23  }
  0x35   : > { %547 = vperm.xlu1 %1099, %v485_v24   ;;  %542 = vperm.xlu0 %1098, %v484_v25  }
  0x39   : > { %418 = vperm.xlu1 %1099, %v348_v26   ;;  %413 = vperm.xlu0 %1098, %v347_v27  }
  0x3d   : > { %557 = vperm.xlu1 %1099, %v487_v28   ;;  %552 = vperm.xlu0 %1098, %v486_v29  }
  0x41   : > { %428 = vperm.xlu1 %1099, %v350_v30   ;;  %423 = vperm.xlu0 %1098, %v349_v31  }
  0x45   : > { %567 = vperm.xlu1 %1099, %v489_v32   ;;  %562 = vperm.xlu0 %1098, %v488_v33  }
  0x49   : > { %673 = vperm.xlu1 %1099, %v659_v34   ;;  %668 = vperm.xlu0 %1098, %v658_v35  }
  0x4d   : > { %683 = vperm.xlu1 %1099, %v661_v36   ;;  %678 = vperm.xlu0 %1098, %v660_v37  }
  0x51   : > { %693 = vperm.xlu1 %1099, %v663_v38   ;;  %688 = vperm.xlu0 %1098, %v662_v39  }
  0x55   : > { %703 = vperm.xlu1 %1099, %v665_v40   ;;  %698 = vperm.xlu0 %1098, %v664_v41  }
  0x59   : > { %842 = vperm.xlu1 %1099, %v832_v42   ;;  %837 = vperm.xlu0 %1098, %v831_v43  }
  0x5d   : > { %852 = vperm.xlu1 %1099, %v834_v44   ;;  %847 = vperm.xlu0 %1098, %v833_v45  }
  0x61   : > { %944 = vperm.xlu1 %1099, %v934_v46   ;;  %939 = vperm.xlu0 %1098, %v933_v47  }
  0x65   : > { %954 = vperm.xlu1 %1099, %v936_v48   ;;  %949 = vperm.xlu0 %1098, %v935_v49  }
  0x69   : > { %986 = vperm.xlu0 %1098, %v983_v50  }
  0x88   : > { %v493_v58 = vpop.permute.xlu1 %492  ;;  %v354_v59 = vpop.permute.xlu0 %353 }
  0x89   : > { %v442_v60 = vmul.f32 %v1344_v56, %v354_v59  ;;  %v443_v61 = vmul.f32 %v1346_v57, %v354_v59 }
  0x8b   : > { %v570_v2 = vadd.f32 %v493_v58, %v442_v60  ;;  %v571_v4 = vadd.f32 %v493_v58, %v443_v61 }
  0x8c   : > { %v498_v62 = vpop.permute.xlu1 %497  ;;  %v359_v63 = vpop.permute.xlu0 %358 }
  0x8d   : > { %v444_v0 = vmul.f32 %v1344_v56, %v359_v63  ;;  %v445_v1 = vmul.f32 %v1346_v57, %v359_v63  ;;  %v603_v9 = vmax.f32 %v571_v4, 0.0  ;;  %v602_v11 = vmax.f32 %v570_v2, 0.0 }
  0x8f   : > { %v572_v5 = vadd.f32 %v498_v62, %v444_v0  ;;  %v573_v6 = vadd.f32 %v498_v62, %v445_v1 }
  0x90   : > { %v369_v7 = vpop.permute.xlu1 %368  ;;  %v364_v8 = vpop.permute.xlu0 %363 }
  0x91   : > { %v605_v10 = vmax.f32 %v573_v6, 0.0  ;;  %v604_v12 = vmax.f32 %v572_v5, 0.0  ;;  %v448_v13 = vmul.f32 %v1344_v56, %v369_v7  ;;  %v449_v14 = vmul.f32 %v1346_v57, %v369_v7 }
  0x92   : > { %v446_v15 = vmul.f32 %v1344_v56, %v364_v8  ;;  %v447_v16 = vmul.f32 %v1346_v57, %v364_v8 }
  0x93   : > { %v643_v19 = vpack.c.bf16 %v605_v10, %v603_v9  ;;  %v642_v20 = vpack.c.bf16 %v604_v12, %v602_v11 }
  0x94   : > { %v508_v17 = vpop.permute.xlu1 %507  ;;  %v503_v18 = vpop.permute.xlu0 %502 }
  0x95   : > { %v576_v21 = vadd.f32 %v508_v17, %v448_v13  ;;  %v577_v22 = vadd.f32 %v508_v17, %v449_v14  ;;  %v574_v23 = vadd.f32 %v503_v18, %v446_v15  ;;  %v575_v24 = vadd.f32 %v503_v18, %v447_v16  ;;  %730 = vmatprep.subr.bf16.mxu0 %v643_v19 }
  0x96   : > { %731 = vmatpush1.bf16.msra.mxu0 %v642_v20 }
  0x97   : > { %v608_v25 = vmax.f32 %v576_v21, 0.0  ;;  %v609_v26 = vmax.f32 %v577_v22, 0.0  ;;  %v606_v27 = vmax.f32 %v574_v23, 0.0  ;;  %v607_v28 = vmax.f32 %v575_v24, 0.0 }
  0x98   : > { %v379_v29 = vpop.permute.xlu1 %378  ;;  %v374_v30 = vpop.permute.xlu0 %373 }
  0x99   : > { %v645_v31 = vpack.c.bf16 %v609_v26, %v607_v28  ;;  %v644_v32 = vpack.c.bf16 %v608_v25, %v606_v27  ;;  %v452_v33 = vmul.f32 %v1344_v56, %v379_v29  ;;  %v453_v34 = vmul.f32 %v1346_v57, %v379_v29 }
  0x9a   : > { %v450_v35 = vmul.f32 %v1344_v56, %v374_v30  ;;  %v451_v36 = vmul.f32 %v1346_v57, %v374_v30 }
  0x9b   : > { %732 = vmatprep.subr.bf16.mxu0 %v645_v31 }
  0x9c   : > { %v518_v37 = vpop.permute.xlu1 %517  ;;  %v513_v38 = vpop.permute.xlu0 %512  ;;  %733 = vmatpush1.bf16.msra.mxu0 %v644_v32 }
  0x9d   : > { %v580_v39 = vadd.f32 %v518_v37, %v452_v33  ;;  %v581_v40 = vadd.f32 %v518_v37, %v453_v34  ;;  %v578_v41 = vadd.f32 %v513_v38, %v450_v35  ;;  %v579_v42 = vadd.f32 %v513_v38, %v451_v36 }
  0x9f   : > { %v612_v43 = vmax.f32 %v580_v39, 0.0  ;;  %v613_v44 = vmax.f32 %v581_v40, 0.0  ;;  %v610_v45 = vmax.f32 %v578_v41, 0.0  ;;  %v611_v46 = vmax.f32 %v579_v42, 0.0 }
  0xa0   : > { %v389_v47 = vpop.permute.xlu1 %388  ;;  %v384_v48 = vpop.permute.xlu0 %383 }
  0xa1   : > { %v647_v49 = vpack.c.bf16 %v613_v44, %v611_v46  ;;  %v646_v50 = vpack.c.bf16 %v612_v43, %v610_v45  ;;  %v456_v54 = vmul.f32 %v1344_v56, %v389_v47  ;;  %v457_v55 = vmul.f32 %v1346_v57, %v389_v47 }
  0xa2   : > { %v454_v58 = vmul.f32 %v1344_v56, %v384_v48  ;;  %v455_v59 = vmul.f32 %v1346_v57, %v384_v48 }
  0xa3   : > { %734 = vmatprep.subr.bf16.mxu0 %v647_v49 }
  0xa4   : > { %v528_v60 = vpop.permute.xlu1 %527  ;;  %v523_v61 = vpop.permute.xlu0 %522  ;;  %735 = vmatpush1.bf16.msra.mxu0 %v646_v50 }
  0xa5   : > { %v584_v62 = vadd.f32 %v528_v60, %v456_v54  ;;  %v585_v63 = vadd.f32 %v528_v60, %v457_v55  ;;  %v582_v0 = vadd.f32 %v523_v61, %v454_v58  ;;  %v583_v1 = vadd.f32 %v523_v61, %v455_v59 }
  0xa7   : > { %v616_v2 = vmax.f32 %v584_v62, 0.0  ;;  %v617_v4 = vmax.f32 %v585_v63, 0.0  ;;  %v614_v5 = vmax.f32 %v582_v0, 0.0  ;;  %v615_v6 = vmax.f32 %v583_v1, 0.0 }
  0xa8   : > { %v399_v7 = vpop.permute.xlu1 %398  ;;  %v394_v8 = vpop.permute.xlu0 %393 }
  0xa9   : > { %v649_v9 = vpack.c.bf16 %v617_v4, %v615_v6  ;;  %v648_v10 = vpack.c.bf16 %v616_v2, %v614_v5  ;;  %v460_v11 = vmul.f32 %v1344_v56, %v399_v7  ;;  %v461_v12 = vmul.f32 %v1346_v57, %v399_v7 }
  0xaa   : > { %v458_v13 = vmul.f32 %v1344_v56, %v394_v8  ;;  %v459_v14 = vmul.f32 %v1346_v57, %v394_v8 }
  0xab   : > { %736 = vmatprep.subr.bf16.mxu0 %v649_v9 }
  0xac   : > { %v538_v15 = vpop.permute.xlu1 %537  ;;  %v533_v16 = vpop.permute.xlu0 %532  ;;  %737 = vmatpush1.bf16.msra.mxu0 %v648_v10 }
  0xad   : > { %v588_v17 = vadd.f32 %v538_v15, %v460_v11  ;;  %v589_v18 = vadd.f32 %v538_v15, %v461_v12  ;;  %v586_v19 = vadd.f32 %v533_v16, %v458_v13  ;;  %v587_v20 = vadd.f32 %v533_v16, %v459_v14 }
  0xaf   : > { %v620_v21 = vmax.f32 %v588_v17, 0.0  ;;  %v621_v22 = vmax.f32 %v589_v18, 0.0  ;;  %v618_v23 = vmax.f32 %v586_v19, 0.0  ;;  %v619_v24 = vmax.f32 %v587_v20, 0.0 }
  0xb0   : > { %v409_v25 = vpop.permute.xlu1 %408  ;;  %v404_v26 = vpop.permute.xlu0 %403 }
  0xb1   : > { %v651_v27 = vpack.c.bf16 %v621_v22, %v619_v24  ;;  %v650_v28 = vpack.c.bf16 %v620_v21, %v618_v23  ;;  %v464_v29 = vmul.f32 %v1344_v56, %v409_v25  ;;  %v465_v30 = vmul.f32 %v1346_v57, %v409_v25  ;;  %v1102_v23 = vld [vmem:[%s1416_s3 + $0x10] sm:$0xff]   ;;  %v1103_v24 = vld [vmem:[%s1416_s3 + $0x18] sm:$0xff]  }
  0xb2   : > { %v462_v31 = vmul.f32 %v1344_v56, %v404_v26  ;;  %v463_v32 = vmul.f32 %v1346_v57, %v404_v26 }
  0xb3   : > { %738 = vmatprep.subr.bf16.mxu0 %v651_v27 }
  0xb4   : > { %v548_v33 = vpop.permute.xlu1 %547  ;;  %v543_v34 = vpop.permute.xlu0 %542  ;;  %739 = vmatpush1.bf16.msra.mxu0 %v650_v28 }
  0xb5   : > { %v592_v35 = vadd.f32 %v548_v33, %v464_v29  ;;  %v593_v36 = vadd.f32 %v548_v33, %v465_v30  ;;  %v590_v37 = vadd.f32 %v543_v34, %v462_v31  ;;  %v591_v38 = vadd.f32 %v543_v34, %v463_v32 }
  0xb7   : > { %v624_v39 = vmax.f32 %v592_v35, 0.0  ;;  %v625_v40 = vmax.f32 %v593_v36, 0.0  ;;  %v622_v41 = vmax.f32 %v590_v37, 0.0  ;;  %v623_v42 = vmax.f32 %v591_v38, 0.0 }
  0xb8   : > { %v419_v43 = vpop.permute.xlu1 %418  ;;  %v414_v44 = vpop.permute.xlu0 %413 }
  0xb9   : > { %v653_v45 = vpack.c.bf16 %v625_v40, %v623_v42  ;;  %v652_v46 = vpack.c.bf16 %v624_v39, %v622_v41  ;;  %v468_v47 = vmul.f32 %v1344_v56, %v419_v43  ;;  %v469_v48 = vmul.f32 %v1346_v57, %v419_v43 }
  0xba   : > { %v466_v49 = vmul.f32 %v1344_v56, %v414_v44  ;;  %v467_v50 = vmul.f32 %v1346_v57, %v414_v44 }
  0xbb   : > { %740 = vmatprep.subr.bf16.mxu0 %v653_v45 }
  0xbc   : > { %v558_v54 = vpop.permute.xlu1 %557  ;;  %v553_v55 = vpop.permute.xlu0 %552  ;;  %741 = vmatpush1.bf16.msra.mxu0 %v652_v46 }
  0xbd   : > { %v596_v58 = vadd.f32 %v558_v54, %v468_v47  ;;  %v597_v59 = vadd.f32 %v558_v54, %v469_v48  ;;  %v594_v60 = vadd.f32 %v553_v55, %v466_v49  ;;  %v595_v61 = vadd.f32 %v553_v55, %v467_v50 }
  0xbf   : > { %v628_v62 = vmax.f32 %v596_v58, 0.0  ;;  %v629_v63 = vmax.f32 %v597_v59, 0.0  ;;  %v626_v0 = vmax.f32 %v594_v60, 0.0  ;;  %v627_v1 = vmax.f32 %v595_v61, 0.0 }
  0xc0   : > { %v429_v2 = vpop.permute.xlu1 %428  ;;  %v424_v4 = vpop.permute.xlu0 %423 }
  0xc1   : > { %v655_v5 = vpack.c.bf16 %v629_v63, %v627_v1  ;;  %v654_v6 = vpack.c.bf16 %v628_v62, %v626_v0  ;;  %v472_v7 = vmul.f32 %v1344_v56, %v429_v2  ;;  %v473_v8 = vmul.f32 %v1346_v57, %v429_v2 }
  0xc2   : > { %v470_v9 = vmul.f32 %v1344_v56, %v424_v4  ;;  %v471_v10 = vmul.f32 %v1346_v57, %v424_v4  ;;  %v1100_v56 = vld [vmem:[%s1416_s3] sm:$0xff]   ;;  %v1101_v57 = vld [vmem:[%s1416_s3 + $0x8] sm:$0xff]  }
  0xc3   : > { %742 = vmatprep.subr.bf16.mxu0 %v655_v5 }
  0xc4   : > { %v568_v11 = vpop.permute.xlu1 %567  ;;  %v563_v12 = vpop.permute.xlu0 %562  ;;  %743 = vmatpush1.bf16.msra.mxu0 %v654_v6 }
  0xc5   : > { %v600_v13 = vadd.f32 %v568_v11, %v472_v7  ;;  %v601_v14 = vadd.f32 %v568_v11, %v473_v8  ;;  %v598_v15 = vadd.f32 %v563_v12, %v470_v9  ;;  %v599_v16 = vadd.f32 %v563_v12, %v471_v10 }
  0xc7   : > { %v632_v17 = vmax.f32 %v600_v13, 0.0  ;;  %v633_v18 = vmax.f32 %v601_v14, 0.0  ;;  %v630_v19 = vmax.f32 %v598_v15, 0.0  ;;  %v631_v20 = vmax.f32 %v599_v16, 0.0 }
  0xc8   : > { %v669_v25 = vpop.permute.xlu0 %668  ;;  %v674_v29 = vpop.permute.xlu1 %673 }
  0xc9   : > { %v657_v21 = vpack.c.bf16 %v633_v18, %v631_v20  ;;  %v656_v22 = vpack.c.bf16 %v632_v17, %v630_v19 }
  0xcb   : > { %744 = vmatprep.subr.bf16.mxu0 %v657_v21 }
  0xcc   : > { %745 = vmatpush1.bf16.msra.mxu0 %v656_v22  ;;  %v679_v40 = vpop.permute.xlu0 %678  ;;  %v684_v45 = vpop.permute.xlu1 %683 }
  0xcf   : > { %763 = vmatmul.mubr.bf16.vlgmr.msra.gmra.mrb[0].mxu0 %v1100_v56 }
  0xd0   : > { %772 = vmatprep.mubr.bf16.mxu0 %v1118_v3  ;;  %v689_v61 = vpop.permute.xlu0 %688  ;;  %v694_v2 = vpop.permute.xlu1 %693 }
  0xd4   : > { %v699_v14 = vpop.permute.xlu0 %698  ;;  %v704_v19 = vpop.permute.xlu1 %703 }
  0xd7   : > { %773 = vmatmul.mubr.bf16.gmra.mrb[4].mxu0 %v1101_v57 }
  0xd8   : > { %782 = vmatprep.mubr.bf16.mxu0 %v1118_v3 }
  0xdf   : > { %783 = vmatmul.mubr.bf16.gmra.mrb[8].mxu0 %v1102_v23 }
  0xe0   : > { %792 = vmatprep.mubr.bf16.mxu0 %v1118_v3 }
  0xe7   : > { %793 = vmatmul.mubr.bf16.gmra.mrb[12].mxu0 %v1103_v24 }
 0x1a2   : > { %v764_v26 = vpop.f32.mrb[0].mxu0 }
 0x1a3   : > { %v765_v27 = vadd.f32 %v764_v26, %v669_v25  ;;  %v766_v28 = vpop.f32.mrb[1].mxu0 }
 0x1a4   : > { %v767_v30 = vadd.f32 %v766_v28, %v669_v25  ;;  %v768_v31 = vpop.f32.mrb[2].mxu0 }
 0x1a5   : > { %v769_v32 = vadd.f32 %v768_v31, %v674_v29  ;;  %v770_v33 = vpop.f32.mrb[3].mxu0  ;;  %v803_v35 = vmax.f32 %v765_v27, 0.0  ;;  %v843_v31 = vpop.permute.xlu1 %842 }
 0x1a6   : > { %v771_v34 = vadd.f32 %v770_v33, %v674_v29  ;;  %v804_v37 = vmax.f32 %v767_v30, 0.0  ;;  %v1104_v29 = vld [vmem:[%s1418_s5] sm:$0xff]   ;;  %v1105_v30 = vld [vmem:[%s1418_s5 + $0x8] sm:$0xff]  }
 0x1a7   : > { %v805_v36 = vmax.f32 %v769_v32, 0.0  ;;  %v838_v32 = vpop.permute.xlu0 %837 }
 0x1a8   : > { %v806_v38 = vmax.f32 %v771_v34, 0.0 }
 0x1a9   : > { %v823_v39 = vpack.c.bf16 %v805_v36, %v803_v35  ;;  %v853_v33 = vpop.permute.xlu1 %852 }
 0x1aa   : > { %v774_v41 = vpop.f32.mrb[4].mxu0  ;;  %v824_v42 = vpack.c.bf16 %v806_v38, %v804_v37 }
 0x1ab   : > { %v775_v43 = vadd.f32 %v774_v41, %v679_v40  ;;  %v776_v44 = vpop.f32.mrb[5].mxu0  ;;  %v848_v34 = vpop.permute.xlu0 %847 }
 0x1ac   : > { %v777_v46 = vadd.f32 %v776_v44, %v679_v40  ;;  %v778_v47 = vpop.f32.mrb[6].mxu0  ;;  %872 = vmatprep.subr.bf16.mxu1 %v824_v42 }
 0x1ad   : > { %v779_v48 = vadd.f32 %v778_v47, %v684_v45  ;;  %v780_v49 = vpop.f32.mrb[7].mxu0  ;;  %873 = vmatpush1.bf16.msra.mxu1 %v823_v39  ;;  %v807_v54 = vmax.f32 %v775_v43, 0.0 }
 0x1ae   : > { %v781_v50 = vadd.f32 %v780_v49, %v684_v45  ;;  %v808_v58 = vmax.f32 %v777_v46, 0.0  ;;  %v945_v45 = vpop.permute.xlu1 %944 }
 0x1af   : > { %v809_v55 = vmax.f32 %v779_v48, 0.0  ;;  %v940_v46 = vpop.permute.xlu0 %939 }
 0x1b0   : > { %v810_v59 = vmax.f32 %v781_v50, 0.0 }
 0x1b1   : > { %v825_v60 = vpack.c.bf16 %v809_v55, %v807_v54 }
 0x1b2   : > { %v826_v62 = vpack.c.bf16 %v810_v59, %v808_v58  ;;  %v784_v63 = vpop.f32.mrb[8].mxu0 }
 0x1b3   : > { %v785_v0 = vadd.f32 %v784_v63, %v689_v61  ;;  %v786_v1 = vpop.f32.mrb[9].mxu0 }
 0x1b4   : > { %v787_v4 = vadd.f32 %v786_v1, %v689_v61  ;;  %v788_v5 = vpop.f32.mrb[10].mxu0  ;;  %874 = vmatprep.subr.bf16.mxu1 %v826_v62 }
 0x1b5   : > { %v789_v6 = vadd.f32 %v788_v5, %v694_v2  ;;  %v790_v7 = vpop.f32.mrb[11].mxu0  ;;  %875 = vmatpush1.bf16.msra.mxu1 %v825_v60  ;;  %v811_v9 = vmax.f32 %v785_v0, 0.0 }
 0x1b6   : > { %v791_v8 = vadd.f32 %v790_v7, %v694_v2  ;;  %v812_v11 = vmax.f32 %v787_v4, 0.0  ;;  %v950_v4 = vpop.permute.xlu0 %949 }
 0x1b7   : > { %v813_v10 = vmax.f32 %v789_v6, 0.0 }
 0x1b8   : > { %v814_v12 = vmax.f32 %v791_v8, 0.0 }
 0x1b9   : > { %v827_v13 = vpack.c.bf16 %v813_v10, %v811_v9  ;;  %v955_v9 = vpop.permute.xlu1 %954 }
 0x1ba   : > { %v828_v15 = vpack.c.bf16 %v814_v12, %v812_v11  ;;  %v794_v16 = vpop.f32.mrb[12].mxu0 }
 0x1bb   : > { %v795_v17 = vadd.f32 %v794_v16, %v699_v14  ;;  %v796_v18 = vpop.f32.mrb[13].mxu0 }
 0x1bc   : > { %v797_v20 = vadd.f32 %v796_v18, %v699_v14  ;;  %v798_v21 = vpop.f32.mrb[14].mxu0  ;;  %876 = vmatprep.subr.bf16.mxu1 %v828_v15 }
 0x1bd   : > { %v799_v22 = vadd.f32 %v798_v21, %v704_v19  ;;  %v800_v56 = vpop.f32.mrb[15].mxu0  ;;  %877 = vmatpush1.bf16.msra.mxu1 %v827_v13  ;;  %v815_v23 = vmax.f32 %v795_v17, 0.0 }
 0x1be   : > { %v801_v57 = vadd.f32 %v800_v56, %v704_v19  ;;  %v816_v25 = vmax.f32 %v797_v20, 0.0 }
 0x1bf   : > { %v817_v24 = vmax.f32 %v799_v22, 0.0 }
 0x1c0   : > { %v818_v26 = vmax.f32 %v801_v57, 0.0 }
 0x1c1   : > { %v829_v27 = vpack.c.bf16 %v817_v24, %v815_v23  ;;  %v987_v23 = vpop.permute.xlu0 %986 }
 0x1c2   : > { %v830_v28 = vpack.c.bf16 %v818_v26, %v816_v25 }
 0x1c4   : > { %878 = vmatprep.subr.bf16.mxu1 %v830_v28 }
 0x1c5   : > { %879 = vmatpush1.bf16.msra.mxu1 %v829_v27  ;;  %v992_v27 = vrot.slane %v987_v23, %v434_v53 }
 0x1c8   : > { %1084 = vmatmul.mubr.msk.bf16.vlgmr.msra.gmra.mrb[0].mxu1 %vm865_vm0, %v1104_v29 }
 0x1c9   : > { %914 = vmatprep.mubr.bf16.mxu1 %v1118_v3 }
 0x1d0   : > { %1085 = vmatmul.mubr.msk.bf16.gmra.mrb[4].mxu1 %vm865_vm0, %v1105_v30 }
 0x29b   : > { %v906_v35 = vpop.f32.mrb[0].mxu1 }
 0x29c   : > { %v907_v36 = vadd.f32 %v906_v35, %v838_v32  ;;  %v908_v37 = vpop.f32.mrb[1].mxu1 }
 0x29d   : > { %v909_v38 = vadd.f32 %v908_v37, %v838_v32  ;;  %v910_v39 = vpop.f32.mrb[2].mxu1 }
 0x29e   : > { %v925_v40 = vmax.f32 %v907_v36, 0.0  ;;  %v911_v41 = vadd.f32 %v910_v39, %v843_v31  ;;  %v912_v42 = vpop.f32.mrb[3].mxu1 }
 0x29f   : > { %v926_v43 = vmax.f32 %v909_v38, 0.0  ;;  %v913_v44 = vadd.f32 %v912_v42, %v843_v31 }
 0x2a0   : > { %v927_v3 = vmax.f32 %v911_v41, 0.0  ;;  %v957_v48 = vmul.f32 %v940_v46, %v925_v40 }
 0x2a1   : > { %v928_v47 = vmax.f32 %v913_v44, 0.0  ;;  %v958_v50 = vmul.f32 %v940_v46, %v926_v43 }
 0x2a2   : > { %v959_v49 = vmul.f32 %v945_v45, %v927_v3 }
 0x2a3   : > { %v960_v54 = vmul.f32 %v945_v45, %v928_v47  ;;  %v916_v55 = vpop.f32.mrb[4].mxu1 }
 0x2a4   : > { %v965_v58 = vadd.f32 %v959_v49, %v957_v48  ;;  %v917_v59 = vadd.f32 %v916_v55, %v848_v34  ;;  %v918_v60 = vpop.f32.mrb[5].mxu1 }
 0x2a5   : > { %v974_v61 = vadd.f32 %v960_v54, %v958_v50  ;;  %v919_v62 = vadd.f32 %v918_v60, %v848_v34  ;;  %v920_v63 = vpop.f32.mrb[6].mxu1  ;;  %v1119_v34 = vmov 1966171168  }
 0x2a6   : > { %v929_v0 = vmax.f32 %v917_v59, 0.0  ;;  %v921_v1 = vadd.f32 %v920_v63, %v853_v33  ;;  %v922_v2 = vpop.f32.mrb[7].mxu1  ;;  %v1005_v35 = vunpack.c.l.s4 %v1119_v34 }
 0x2a7   : > { %v930_v5 = vmax.f32 %v919_v62, 0.0  ;;  %v923_v6 = vadd.f32 %v922_v2, %v853_v33 }
 0x2a8   : > { %v961_v7 = vmul.f32 %v950_v4, %v929_v0  ;;  %v931_v8 = vmax.f32 %v921_v1, 0.0  ;;  %v1006_v36 = vunpack.c.0.s8 %v1005_v35 }
 0x2a9   : > { %v962_v10 = vmul.f32 %v950_v4, %v930_v5  ;;  %v932_v11 = vmax.f32 %v923_v6, 0.0 }
 0x2aa   : > { %v966_v12 = vadd.f32 %v965_v58, %v961_v7  ;;  %v963_v13 = vmul.f32 %v955_v9, %v931_v8  ;;  %v1009_v41 = vsub.s32 %v1006_v36, %v1334_v52 }
 0x2ab   : > { %v975_v14 = vadd.f32 %v974_v61, %v962_v10  ;;  %v964_v15 = vmul.f32 %v955_v9, %v932_v11 }
 0x2ac   : > { %v967_v16 = vadd.f32 %v966_v12, %v963_v13 }
 0x2ad   : > { %v976_v17 = vadd.f32 %v975_v14, %v964_v15 }
 0x2ae   : > { %v968_v18 = vrot.slane %v967_v16, 4 }
 0x2af   : > { %v977_v19 = vrot.slane %v976_v17, 4 }
 0x2b0   : > { %v969_v20 = vadd.f32 %v968_v18, %v967_v16 }
 0x2b1   : > { %v978_v21 = vadd.f32 %v977_v19, %v976_v17 }
 0x2b2   : > { %v970_v22 = vrot.slane %v969_v20, 2 }
 0x2b3   : > { %v979_v56 = vrot.slane %v978_v21, 2 }
 0x2b4   : > { %v971_v57 = vadd.f32 %v970_v22, %v969_v20 }
 0x2b5   : > { %v980_v24 = vadd.f32 %v979_v56, %v978_v21 }
 0x2b6   : > { %v972_v25 = vrot.slane %v971_v57, 1 }
 0x2b7   : > { %v981_v26 = vrot.slane %v980_v24, 1 }
 0x2b8   : > { %v973_v28 = vadd.f32 %v972_v25, %v971_v57 }
 0x2b9   : > { %v982_v29 = vadd.f32 %v981_v26, %v980_v24 }
 0x2ba   : > { %v993_v30 = vadd.f32 %v992_v27, %v973_v28 }
 0x2bb   : > { %v994_v31 = vadd.f32 %v992_v27, %v982_v29 }
 0x2bc   : > { %v995_v32 = vmul.f32 1.442695, %v993_v30 }
 0x2bd   : > { %v997_v33 = vmul.f32 1.442695, %v994_v31 }
 0x2be   : > { %1106 = vpow2.f32 %v995_v32 }
 0x2bf   : > { %1108 = vpow2.f32 %v997_v33 }
 0x2c8   : > { %v1107_v37 = vpop.eup %1106 }
 0x2c9   : > { %v1109_v38 = vpop.eup %1108  ;;  %v999_v39 = vadd.f32 1e-08, %v1107_v37 }
 0x2ca   : > { %v1000_v40 = vadd.f32 1e-08, %v1109_v38 }
 0x2cc   : > { %v1003_v42 = vcombine.low %v999_v39, %v1000_v40 }
 0x2ce   : > { %v1010_v53 = vrot.slane %v1003_v42, %v1009_v41 }
 0x2d0   : > { %v1017_v43 = vrot.slane %v1010_v53, %v1009_v41 }
 0x2d2   : > { %1023 = vst.msk [vmem:[%s331_s25] sm:$0x3] %vm1021_vm1, %v1017_v43 }
 0x2d3 PF: > { %s21_s11 = sadd.s32 1, %s1116_s11  }
 0x2d4   : > { %p18_p4 = scmp.ge.s32.totalorder %s21_s11, 4  }
 0x2d6   :  { %20 = sbr.rel (!%p18_p4) target bundleno = 3 (0x3), region = 86 }

</bundles_post_ra>
